<compile_context>
chip_gen: v7x
topology: tpu7x:2x2x1
jax: 0.10.0
libtpu: 0.0.40
codegen_flags: <defaults>
</compile_context>

<pallas_src>
import functools

import jax
import jax.numpy as jnp
from jax.experimental import pallas as pl
from jax.experimental.pallas import tpu as pltpu


def _gelu_exact(v):
    # torch.nn.GELU() default is the exact (erf-based) GELU; keep it in f32.
    return 0.5 * v * (1.0 + jax.lax.erf(v * 0.7071067811865476))


def _mlp_kernel(x_ref,
                w_in_ref, b_in_ref,
                w_hid_ref, b_hid_ref,
                w_out_ref, b_out_ref,
                o_ref, *, num_hidden):
    # Matmul operand dtype comes from the weights (bf16 by default, f32 fallback).
    mm_dtype = w_in_ref.dtype

    x = x_ref[...].astype(mm_dtype)
    h = jnp.dot(x, w_in_ref[...], preferred_element_type=jnp.float32)
    h = _gelu_exact(h + b_in_ref[...])

    for l in range(num_hidden):  # statically unrolled: 5 small (H,H) matmuls
        h = jnp.dot(h.astype(mm_dtype), w_hid_ref[l],
                    preferred_element_type=jnp.float32)
        h = _gelu_exact(h + b_hid_ref[l])

    out = jnp.dot(h.astype(mm_dtype), w_out_ref[...],
                  preferred_element_type=jnp.float32) + b_out_ref[...]
    o_ref[...] = out.astype(o_ref.dtype)


def _round_up(v, m):
    return -(-v // m) * m


def feature_projection_mlp_big(x, params, *, row_tile=512,
                               matmul_dtype=jnp.bfloat16):
    """x: (..., in_features). params: stacked (in,out)-layout weights + (1,out) biases."""
    in_features = x.shape[-1]
    lead_shape = x.shape[:-1]
    rows = 1
    for d in lead_shape:
        rows *= d
    x2d = x.reshape(rows, in_features)

    out_features = params["w_out"].shape[1]
    num_hidden = params["w_hidden"].shape[0]

    # Effective row tile:
    #  * clamp user tile to [8, 2048] (2048 keeps activations well under the
    #    32 MiB scoped VMEM default on v7x, which has half the VMEM of v5e/v6e),
    #  * no larger than needed for small inputs,
    #  * multiple of 8 (sublane granularity; x/out blocks stay f32),
    #  * allow >= 2 grid steps when possible so both v7x TensorCores get work.
    tile = max(8, min(int(row_tile), 2048))
    tile = min(tile, _round_up(rows, 8))
    if rows >= 16:
        tile = min(tile, _round_up(_round_up(rows, 8) // 2, 8))
    tile = max(8, (tile // 8) * 8)

    rows_padded = _round_up(rows, tile)
    if rows_padded != rows:
        x2d = jnp.pad(x2d, ((0, rows_padded - rows), (0, 0)))
    grid = (pl.cdiv(rows_padded, tile),)

    # Weights in matmul dtype (bf16 -> full-rate MXU path); biases stay f32 so
    # the bias-add + GELU run on the f32 accumulator.
    w_in = params["w_in"].astype(matmul_dtype)
    w_hid = params["w_hidden"].astype(matmul_dtype)
    w_out = params["w_out"].astype(matmul_dtype)
    b_in = params["b_in"].astype(jnp.float32)
    b_hid = params["b_hidden"].astype(jnp.float32)
    b_out = params["b_out"].astype(jnp.float32)

    def full_spec(a):
        ndim = a.ndim
        return pl.BlockSpec(a.shape, lambda i, _n=ndim: (0,) * _n)

    in_specs = [
        pl.BlockSpec((tile, in_features), lambda i: (i, 0)),  # x tile (rows axis)
        full_spec(w_in), full_spec(b_in),
        full_spec(w_hid), full_spec(b_hid),
        full_spec(w_out), full_spec(b_out),
    ]
    out_spec = pl.BlockSpec((tile, out_features), lambda i: (i, 0))

    out2d = pl.pallas_call(
        functools.partial(_mlp_kernel, num_hidden=num_hidden),
        out_shape=jax.ShapeDtypeStruct((rows_padded, out_features), x.dtype),
        grid=grid,
        in_specs=in_specs,
        out_specs=out_spec,
        compiler_params=pltpu.CompilerParams(
            dimension_semantics=("parallel",),
            vmem_limit_bytes=48 * 1024 * 1024,  # headroom; < 64 MiB v7x physical
        ),
    )(x2d, w_in, b_in, w_hid, b_hid, w_out, b_out)

    return out2d[:rows].reshape(*lead_shape, out_features)


def init_params(key, in_features, out_features, dtype=jnp.float32, num_hidden=5):
    """torch.nn.Linear default init, stored pre-transposed as (in, out)."""
    hidden = (in_features + out_features) // 2

    def linear(k, fan_in, fan_out):
        kw, kb = jax.random.split(k)
        bound = 1.0 / (fan_in ** 0.5)
        w = jax.random.uniform(kw, (fan_in, fan_out), dtype, -bound, bound)
        b = jax.random.uniform(kb, (1, fan_out), dtype, -bound, bound)
        return w, b

    keys = jax.random.split(key, num_hidden + 2)
    w_in, b_in = linear(keys[0], in_features, hidden)
    hid = [linear(keys[1 + i], hidden, hidden) for i in range(num_hidden)]
    w_out, b_out = linear(keys[-1], hidden, out_features)
    return {
        "w_in": w_in, "b_in": b_in,
        "w_hidden": jnp.stack([w for w, _ in hid]),
        "b_hidden": jnp.stack([b for _, b in hid]),
        "w_out": w_out, "b_out": b_out,
    }


def _reference(x, params):
    h = x @ params["w_in"] + params["b_in"][0]
    h = _gelu_exact(h)
    for l in range(params["w_hidden"].shape[0]):
        h = h @ params["w_hidden"][l] + params["b_hidden"][l, 0]
        h = _gelu_exact(h)
    return h @ params["w_out"] + params["b_out"][0]


if __name__ == "__main__":
    in_features = 32
    out_features = 48        # hidden = (32 + 48) // 2 = 40
    batch, seq = 2, 8        # x: (2, 8, 32) -> 16 rows of 32 features

    key = jax.random.PRNGKey(0)
    kx, kp = jax.random.split(key)
    x = jax.random.normal(kx, (batch, seq, in_features), jnp.float32)
    params = init_params(kp, in_features, out_features)

    # Fast path: bf16 matmuls on the MXU, f32 accumulation / bias / GELU.
    run = jax.jit(functools.partial(feature_projection_mlp_big, row_tile=512))
    out = jax.block_until_ready(run(x, params))

    # Bit-accurate path for tight verification.
    run_f32 = jax.jit(functools.partial(feature_projection_mlp_big,
                                        row_tile=512,
                                        matmul_dtype=jnp.float32))
    out_f32 = jax.block_until_ready(run_f32(x, params))

    ref = _reference(x.reshape(-1, in_features), params).reshape(
        batch, seq, out_features)

    assert out.shape == (batch, seq, out_features)
    assert jnp.allclose(out_f32, ref, atol=1e-4, rtol=1e-4), "f32 path mismatch"
    assert jnp.allclose(out, ref, atol=1e-1, rtol=1e-1), "bf16 path mismatch"

    print("KERNEL_OK")
</pallas_src>

<mosaic_0001>
module attributes {stable_mosaic.version = 11 : i64} {
  func.func @_mlp_kernel(%arg0: i32, %arg1: memref<8x32xf32, #tpu.memory_space<vmem>>, %arg2: memref<32x40xbf16, #tpu.memory_space<vmem>>, %arg3: memref<1x40xf32, #tpu.memory_space<vmem>>, %arg4: memref<5x40x40xbf16, #tpu.memory_space<vmem>>, %arg5: memref<5x1x40xf32, #tpu.memory_space<vmem>>, %arg6: memref<40x48xbf16, #tpu.memory_space<vmem>>, %arg7: memref<1x48xf32, #tpu.memory_space<vmem>>, %arg8: memref<8x48xf32, #tpu.memory_space<vmem>>) attributes {dimension_semantics = [#tpu.dimension_semantics<parallel>], iteration_bounds = array<i64: 2>, scalar_prefetch = 0 : i64, scratch_operands = 0 : i64, tpu.core_type = #tpu.core_type<tc>, window_params = [{transform_indices = @transform_0, window_bounds = array<i64: 8, 32>}, {pipeline_mode = #tpu.pipeline_mode<synchronous>, transform_indices = @transform_1, window_bounds = array<i64: 32, 40>}, {pipeline_mode = #tpu.pipeline_mode<synchronous>, transform_indices = @transform_2, window_bounds = array<i64: 1, 40>}, {pipeline_mode = #tpu.pipeline_mode<synchronous>, transform_indices = @transform_3, window_bounds = array<i64: 5, 40, 40>}, {pipeline_mode = #tpu.pipeline_mode<synchronous>, transform_indices = @transform_4, window_bounds = array<i64: 5, 1, 40>}, {pipeline_mode = #tpu.pipeline_mode<synchronous>, transform_indices = @transform_5, window_bounds = array<i64: 40, 48>}, {pipeline_mode = #tpu.pipeline_mode<synchronous>, transform_indices = @transform_6, window_bounds = array<i64: 1, 48>}, {transform_indices = @transform_7, window_bounds = array<i64: 8, 48>}]} {
    %c0 = arith.constant 0 : index
    %c0_0 = arith.constant 0 : index
    %0 = vector.load %arg1[%c0, %c0_0] : memref<8x32xf32, #tpu.memory_space<vmem>>, vector<8x32xf32>
    %1 = arith.truncf %0 : vector<8x32xf32> to vector<8x32xbf16>
    %c0_1 = arith.constant 0 : index
    %c0_2 = arith.constant 0 : index
    %2 = vector.load %arg2[%c0_1, %c0_2] : memref<32x40xbf16, #tpu.memory_space<vmem>>, vector<32x40xbf16>
    %cst = arith.constant dense<0.000000e+00> : vector<8x40xf32>
    %3 = tpu.matmul %1, %2, %cst {dimension_numbers = #tpu.dot_dimension_numbers<[1], [0], [0], [1], [0, 0, 1, 1], [], []>} : vector<8x32xbf16>, vector<32x40xbf16>, vector<8x40xf32> -> vector<8x40xf32>
    %c0_3 = arith.constant 0 : index
    %c0_4 = arith.constant 0 : index
    %4 = vector.load %arg3[%c0_3, %c0_4] : memref<1x40xf32, #tpu.memory_space<vmem>>, vector<1x40xf32>
    %5 = vector.broadcast %4 : vector<1x40xf32> to vector<8x40xf32>
    %6 = arith.addf %3, %5 : vector<8x40xf32>
    %cst_5 = arith.constant 5.000000e-01 : f32
    %7 = vector.broadcast %cst_5 : f32 to vector<8x40xf32>
    %8 = arith.mulf %7, %6 : vector<8x40xf32>
    %cst_6 = arith.constant 0.707106769 : f32
    %9 = vector.broadcast %cst_6 : f32 to vector<8x40xf32>
    %10 = arith.mulf %6, %9 : vector<8x40xf32>
    %11 = math.erf %10 : vector<8x40xf32>
    %cst_7 = arith.constant 1.000000e+00 : f32
    %12 = vector.broadcast %cst_7 : f32 to vector<8x40xf32>
    %13 = arith.addf %12, %11 : vector<8x40xf32>
    %14 = arith.mulf %8, %13 : vector<8x40xf32>
    %15 = arith.truncf %14 : vector<8x40xf32> to vector<8x40xbf16>
    %c0_8 = arith.constant 0 : index
    %c0_9 = arith.constant 0 : index
    %c0_10 = arith.constant 0 : index
    %16 = vector.load %arg4[%c0_8, %c0_9, %c0_10] : memref<5x40x40xbf16, #tpu.memory_space<vmem>>, vector<1x40x40xbf16>
    %17 = vector.shape_cast %16 : vector<1x40x40xbf16> to vector<40x40xbf16>
    %cst_11 = arith.constant dense<0.000000e+00> : vector<8x40xf32>
    %18 = tpu.matmul %15, %17, %cst_11 {dimension_numbers = #tpu.dot_dimension_numbers<[1], [0], [0], [1], [0, 0, 1, 1], [], []>} : vector<8x40xbf16>, vector<40x40xbf16>, vector<8x40xf32> -> vector<8x40xf32>
    %c0_12 = arith.constant 0 : index
    %c0_13 = arith.constant 0 : index
    %c0_14 = arith.constant 0 : index
    %19 = vector.load %arg5[%c0_12, %c0_13, %c0_14] : memref<5x1x40xf32, #tpu.memory_space<vmem>>, vector<1x1x40xf32>
    %20 = vector.shape_cast %19 : vector<1x1x40xf32> to vector<1x40xf32>
    %21 = vector.broadcast %20 : vector<1x40xf32> to vector<8x40xf32>
    %22 = arith.addf %18, %21 : vector<8x40xf32>
    %cst_15 = arith.constant 5.000000e-01 : f32
    %23 = vector.broadcast %cst_15 : f32 to vector<8x40xf32>
    %24 = arith.mulf %23, %22 : vector<8x40xf32>
    %cst_16 = arith.constant 0.707106769 : f32
    %25 = vector.broadcast %cst_16 : f32 to vector<8x40xf32>
    %26 = arith.mulf %22, %25 : vector<8x40xf32>
    %27 = math.erf %26 : vector<8x40xf32>
    %cst_17 = arith.constant 1.000000e+00 : f32
    %28 = vector.broadcast %cst_17 : f32 to vector<8x40xf32>
    %29 = arith.addf %28, %27 : vector<8x40xf32>
    %30 = arith.mulf %24, %29 : vector<8x40xf32>
    %31 = arith.truncf %30 : vector<8x40xf32> to vector<8x40xbf16>
    %c1 = arith.constant 1 : index
    %c0_18 = arith.constant 0 : index
    %c0_19 = arith.constant 0 : index
    %32 = vector.load %arg4[%c1, %c0_18, %c0_19] : memref<5x40x40xbf16, #tpu.memory_space<vmem>>, vector<1x40x40xbf16>
    %33 = vector.shape_cast %32 : vector<1x40x40xbf16> to vector<40x40xbf16>
    %cst_20 = arith.constant dense<0.000000e+00> : vector<8x40xf32>
    %34 = tpu.matmul %31, %33, %cst_20 {dimension_numbers = #tpu.dot_dimension_numbers<[1], [0], [0], [1], [0, 0, 1, 1], [], []>} : vector<8x40xbf16>, vector<40x40xbf16>, vector<8x40xf32> -> vector<8x40xf32>
    %c1_21 = arith.constant 1 : index
    %c0_22 = arith.constant 0 : index
    %c0_23 = arith.constant 0 : index
    %35 = vector.load %arg5[%c1_21, %c0_22, %c0_23] : memref<5x1x40xf32, #tpu.memory_space<vmem>>, vector<1x1x40xf32>
    %36 = vector.shape_cast %35 : vector<1x1x40xf32> to vector<1x40xf32>
    %37 = vector.broadcast %36 : vector<1x40xf32> to vector<8x40xf32>
    %38 = arith.addf %34, %37 : vector<8x40xf32>
    %cst_24 = arith.constant 5.000000e-01 : f32
    %39 = vector.broadcast %cst_24 : f32 to vector<8x40xf32>
    %40 = arith.mulf %39, %38 : vector<8x40xf32>
    %cst_25 = arith.constant 0.707106769 : f32
    %41 = vector.broadcast %cst_25 : f32 to vector<8x40xf32>
    %42 = arith.mulf %38, %41 : vector<8x40xf32>
    %43 = math.erf %42 : vector<8x40xf32>
    %cst_26 = arith.constant 1.000000e+00 : f32
    %44 = vector.broadcast %cst_26 : f32 to vector<8x40xf32>
    %45 = arith.addf %44, %43 : vector<8x40xf32>
    %46 = arith.mulf %40, %45 : vector<8x40xf32>
    %47 = arith.truncf %46 : vector<8x40xf32> to vector<8x40xbf16>
    %c2 = arith.constant 2 : index
    %c0_27 = arith.constant 0 : index
    %c0_28 = arith.constant 0 : index
    %48 = vector.load %arg4[%c2, %c0_27, %c0_28] : memref<5x40x40xbf16, #tpu.memory_space<vmem>>, vector<1x40x40xbf16>
    %49 = vector.shape_cast %48 : vector<1x40x40xbf16> to vector<40x40xbf16>
    %cst_29 = arith.constant dense<0.000000e+00> : vector<8x40xf32>
    %50 = tpu.matmul %47, %49, %cst_29 {dimension_numbers = #tpu.dot_dimension_numbers<[1], [0], [0], [1], [0, 0, 1, 1], [], []>} : vector<8x40xbf16>, vector<40x40xbf16>, vector<8x40xf32> -> vector<8x40xf32>
    %c2_30 = arith.constant 2 : index
    %c0_31 = arith.constant 0 : index
    %c0_32 = arith.constant 0 : index
    %51 = vector.load %arg5[%c2_30, %c0_31, %c0_32] : memref<5x1x40xf32, #tpu.memory_space<vmem>>, vector<1x1x40xf32>
    %52 = vector.shape_cast %51 : vector<1x1x40xf32> to vector<1x40xf32>
    %53 = vector.broadcast %52 : vector<1x40xf32> to vector<8x40xf32>
    %54 = arith.addf %50, %53 : vector<8x40xf32>
    %cst_33 = arith.constant 5.000000e-01 : f32
    %55 = vector.broadcast %cst_33 : f32 to vector<8x40xf32>
    %56 = arith.mulf %55, %54 : vector<8x40xf32>
    %cst_34 = arith.constant 0.707106769 : f32
    %57 = vector.broadcast %cst_34 : f32 to vector<8x40xf32>
    %58 = arith.mulf %54, %57 : vector<8x40xf32>
    %59 = math.erf %58 : vector<8x40xf32>
    %cst_35 = arith.constant 1.000000e+00 : f32
    %60 = vector.broadcast %cst_35 : f32 to vector<8x40xf32>
    %61 = arith.addf %60, %59 : vector<8x40xf32>
    %62 = arith.mulf %56, %61 : vector<8x40xf32>
    %63 = arith.truncf %62 : vector<8x40xf32> to vector<8x40xbf16>
    %c3 = arith.constant 3 : index
    %c0_36 = arith.constant 0 : index
    %c0_37 = arith.constant 0 : index
    %64 = vector.load %arg4[%c3, %c0_36, %c0_37] : memref<5x40x40xbf16, #tpu.memory_space<vmem>>, vector<1x40x40xbf16>
    %65 = vector.shape_cast %64 : vector<1x40x40xbf16> to vector<40x40xbf16>
    %cst_38 = arith.constant dense<0.000000e+00> : vector<8x40xf32>
    %66 = tpu.matmul %63, %65, %cst_38 {dimension_numbers = #tpu.dot_dimension_numbers<[1], [0], [0], [1], [0, 0, 1, 1], [], []>} : vector<8x40xbf16>, vector<40x40xbf16>, vector<8x40xf32> -> vector<8x40xf32>
    %c3_39 = arith.constant 3 : index
    %c0_40 = arith.constant 0 : index
    %c0_41 = arith.constant 0 : index
    %67 = vector.load %arg5[%c3_39, %c0_40, %c0_41] : memref<5x1x40xf32, #tpu.memory_space<vmem>>, vector<1x1x40xf32>
    %68 = vector.shape_cast %67 : vector<1x1x40xf32> to vector<1x40xf32>
    %69 = vector.broadcast %68 : vector<1x40xf32> to vector<8x40xf32>
    %70 = arith.addf %66, %69 : vector<8x40xf32>
    %cst_42 = arith.constant 5.000000e-01 : f32
    %71 = vector.broadcast %cst_42 : f32 to vector<8x40xf32>
    %72 = arith.mulf %71, %70 : vector<8x40xf32>
    %cst_43 = arith.constant 0.707106769 : f32
    %73 = vector.broadcast %cst_43 : f32 to vector<8x40xf32>
    %74 = arith.mulf %70, %73 : vector<8x40xf32>
    %75 = math.erf %74 : vector<8x40xf32>
    %cst_44 = arith.constant 1.000000e+00 : f32
    %76 = vector.broadcast %cst_44 : f32 to vector<8x40xf32>
    %77 = arith.addf %76, %75 : vector<8x40xf32>
    %78 = arith.mulf %72, %77 : vector<8x40xf32>
    %79 = arith.truncf %78 : vector<8x40xf32> to vector<8x40xbf16>
    %c4 = arith.constant 4 : index
    %c0_45 = arith.constant 0 : index
    %c0_46 = arith.constant 0 : index
    %80 = vector.load %arg4[%c4, %c0_45, %c0_46] : memref<5x40x40xbf16, #tpu.memory_space<vmem>>, vector<1x40x40xbf16>
    %81 = vector.shape_cast %80 : vector<1x40x40xbf16> to vector<40x40xbf16>
    %cst_47 = arith.constant dense<0.000000e+00> : vector<8x40xf32>
    %82 = tpu.matmul %79, %81, %cst_47 {dimension_numbers = #tpu.dot_dimension_numbers<[1], [0], [0], [1], [0, 0, 1, 1], [], []>} : vector<8x40xbf16>, vector<40x40xbf16>, vector<8x40xf32> -> vector<8x40xf32>
    %c4_48 = arith.constant 4 : index
    %c0_49 = arith.constant 0 : index
    %c0_50 = arith.constant 0 : index
    %83 = vector.load %arg5[%c4_48, %c0_49, %c0_50] : memref<5x1x40xf32, #tpu.memory_space<vmem>>, vector<1x1x40xf32>
    %84 = vector.shape_cast %83 : vector<1x1x40xf32> to vector<1x40xf32>
    %85 = vector.broadcast %84 : vector<1x40xf32> to vector<8x40xf32>
    %86 = arith.addf %82, %85 : vector<8x40xf32>
    %cst_51 = arith.constant 5.000000e-01 : f32
    %87 = vector.broadcast %cst_51 : f32 to vector<8x40xf32>
    %88 = arith.mulf %87, %86 : vector<8x40xf32>
    %cst_52 = arith.constant 0.707106769 : f32
    %89 = vector.broadcast %cst_52 : f32 to vector<8x40xf32>
    %90 = arith.mulf %86, %89 : vector<8x40xf32>
    %91 = math.erf %90 : vector<8x40xf32>
    %cst_53 = arith.constant 1.000000e+00 : f32
    %92 = vector.broadcast %cst_53 : f32 to vector<8x40xf32>
    %93 = arith.addf %92, %91 : vector<8x40xf32>
    %94 = arith.mulf %88, %93 : vector<8x40xf32>
    %95 = arith.truncf %94 : vector<8x40xf32> to vector<8x40xbf16>
    %c0_54 = arith.constant 0 : index
    %c0_55 = arith.constant 0 : index
    %96 = vector.load %arg6[%c0_54, %c0_55] : memref<40x48xbf16, #tpu.memory_space<vmem>>, vector<40x48xbf16>
    %cst_56 = arith.constant dense<0.000000e+00> : vector<8x48xf32>
    %97 = tpu.matmul %95, %96, %cst_56 {dimension_numbers = #tpu.dot_dimension_numbers<[1], [0], [0], [1], [0, 0, 1, 1], [], []>} : vector<8x40xbf16>, vector<40x48xbf16>, vector<8x48xf32> -> vector<8x48xf32>
    %c0_57 = arith.constant 0 : index
    %c0_58 = arith.constant 0 : index
    %98 = vector.load %arg7[%c0_57, %c0_58] : memref<1x48xf32, #tpu.memory_space<vmem>>, vector<1x48xf32>
    %99 = vector.broadcast %98 : vector<1x48xf32> to vector<8x48xf32>
    %100 = arith.addf %97, %99 : vector<8x48xf32>
    %c0_59 = arith.constant 0 : index
    %c0_60 = arith.constant 0 : index
    %101 = vector.load %arg8[%c0_59, %c0_60] : memref<8x48xf32, #tpu.memory_space<vmem>>, vector<8x48xf32>
    tpu.vector_store %arg8[%c0_59, %c0_60], %100 {strides = array<i32>} : memref<8x48xf32, #tpu.memory_space<vmem>>, vector<8x48xf32>,
    return
  }
  func.func @transform_0(%arg0: i32) -> (i32, i32) {
    %c0_i32 = arith.constant 0 : i32
    %c0_i32_0 = arith.constant 0 : i32
    return %arg0, %c0_i32 : i32, i32
  }
  func.func @transform_1(%arg0: i32) -> (i32, i32) {
    %c0_i32 = arith.constant 0 : i32
    %c0_i32_0 = arith.constant 0 : i32
    %c0_i32_1 = arith.constant 0 : i32
    return %c0_i32, %c0_i32_0 : i32, i32
  }
  func.func @transform_2(%arg0: i32) -> (i32, i32) {
    %c0_i32 = arith.constant 0 : i32
    %c0_i32_0 = arith.constant 0 : i32
    %c0_i32_1 = arith.constant 0 : i32
    return %c0_i32, %c0_i32_0 : i32, i32
  }
  func.func @transform_3(%arg0: i32) -> (i32, i32, i32) {
    %c0_i32 = arith.constant 0 : i32
    %c0_i32_0 = arith.constant 0 : i32
    %c0_i32_1 = arith.constant 0 : i32
    %c0_i32_2 = arith.constant 0 : i32
    return %c0_i32, %c0_i32_0, %c0_i32_1 : i32, i32, i32
  }
  func.func @transform_4(%arg0: i32) -> (i32, i32, i32) {
    %c0_i32 = arith.constant 0 : i32
    %c0_i32_0 = arith.constant 0 : i32
    %c0_i32_1 = arith.constant 0 : i32
    %c0_i32_2 = arith.constant 0 : i32
    return %c0_i32, %c0_i32_0, %c0_i32_1 : i32, i32, i32
  }
  func.func @transform_5(%arg0: i32) -> (i32, i32) {
    %c0_i32 = arith.constant 0 : i32
    %c0_i32_0 = arith.constant 0 : i32
    %c0_i32_1 = arith.constant 0 : i32
    return %c0_i32, %c0_i32_0 : i32, i32
  }
  func.func @transform_6(%arg0: i32) -> (i32, i32) {
    %c0_i32 = arith.constant 0 : i32
    %c0_i32_0 = arith.constant 0 : i32
    %c0_i32_1 = arith.constant 0 : i32
    return %c0_i32, %c0_i32_0 : i32, i32
  }
  func.func @transform_7(%arg0: i32) -> (i32, i32) {
    %c0_i32 = arith.constant 0 : i32
    %c0_i32_0 = arith.constant 0 : i32
    return %arg0, %c0_i32 : i32, i32
  }
}

</mosaic_0001>

<bundles_post_ra>
// kernel: feature_projection_mlp_big.1
= control target key start
LH: loop header
LB: loop body
LE: loop exit
PB: predicated region body
PF: predicated region fallthrough
CT: control target
= control target key end

     0   :  { %12 = vsyncpa [#allocation3], 0  ;;  %s1473_s0 = inlined_call_operand.vmem [shape: f32[16,32], index: 0, kind: input, shape index: {}]   ;;  %s1474_s1 = inlined_call_operand.vmem [shape: bf16[32,40], index: 1, kind: input, shape index: {}]   ;;  %s1475_s2 = inlined_call_operand.vmem [shape: f32[1,40], index: 2, kind: input, shape index: {}]   ;;  %s1476_s3 = inlined_call_operand.vmem [shape: bf16[5,40,40], index: 3, kind: input, shape index: {}]   ;;  %s1477_s4 = inlined_call_operand.vmem [shape: f32[5,1,40], index: 4, kind: input, shape index: {}]   ;;  %s1478_s5 = inlined_call_operand.vmem [shape: bf16[40,48], index: 5, kind: input, shape index: {}]   ;;  %s1479_s6 = inlined_call_operand.vmem [shape: f32[1,48], index: 6, kind: input, shape index: {}]   ;;  %s1480_s7 = inlined_call_operand.hbm [shape: f32[16,48], index: 7, kind: output, shape index: {}]  }
   0x1   :  { %14 = vsyncpa [#allocation3 + $0x1], 0  ;;  %s1246_s24 = smov 0   ;;  %s1248_s25 = smov 0  }
   0x2   :  { %s1250_s26 = smov 0   ;;  %s1252_s27 = smov 0  }
   0x3 LB: > { %s1267_s28 = sadd.s32 4294967295, %s1201_s27   ;;  %s903_s29 = sadd.s32 4294967294, %s1201_s27   ;;  %s1201_s27 = sphi %s1252_s27, %s1486_s27   ;;  %s1197_s26 = sphi %s1250_s26, %s1485_s26   ;;  %s1193_s25 = sphi %s1248_s25, %s1484_s25   ;;  %s1189_s24 = sphi %s1246_s24, %s1483_s24  }
   0x4   : > { %s1271_s30 = sadd.s32 1, %s1201_s27   ;;  %s179_s8 = sadd.s32 1, %s1197_s26 }
   0x5   : > { %s176_s9 = ssub.s32 %s1201_s27, %s1271_s30  ;;  %p189_p0 = scmp.ne.s32.totalorder %s1197_s26, %s1193_s25 }
   0x6   : > { %p177_p1 = scmp.eq.s32.totalorder %s176_s9, 0  ;;  %p190_p2 = scmp.eq.s32.totalorder %s1267_s28, 1 }
   0x7   : > { %p195_p3 = scmp.ne.s32.totalorder %s1193_s25, %s1189_s24  ;;  %p196_p4 = scmp.eq.s32.totalorder %s903_s29, 1 }
   0x8   : > { %s1282_s10 = scalar_select %p177_p1, %s1197_s26, %s179_s8  }
   0x9   : > { %p1284_p5 = por %p190_p2, %p189_p0  ;;  %p1288_p6 = por %p196_p4, %p195_p3 }
   0xa   : > { %p906_p7 = scmp.ge.s32.totalorder %s1201_s27, 1  ;;  %p239_p8 = scmp.lt.s32.totalorder %s1201_s27, 3 }
   0xc   : > { %p240_p9 = pnand %p906_p7, %p239_p8 }
   0xd   : > { %v1107_v0 = vld [vmem:[%s1474_s1] sm:$0xff] (!%p240_p9)   ;;  %v1203_v1 = vmov (!%p240_p9), 0.0   ;;  %v1108_v2 = vld [vmem:[%s1474_s1 + $0x8] sm:$0xff] (!%p240_p9)   ;;  %vm1204_vm0 = vmmov (!%p240_p9), 0   ;;  %p270_p10 = scmp.lt.s32.totalorder (!%p240_p9), %s1267_s28, 1  ;;  %vm300_vm1 = vcmask (!%p240_p9), 261120  }
   0xe   : > { %243 = sbr.rel (%p240_p9) target bundleno = 1654 (0x676), region = 48  ;;  %998 = vmatprep.subr.bf16.mxu0 (!%p240_p9), %v1203_v1  ;;  %1006 = vmatprep.subr.bf16.mxu1 (!%p240_p9), %v1203_v1  ;;  %v1109_v5 = vld [vmem:[%s1476_s3] sm:$0xff] (!%p240_p9)   ;;  %v1110_v6 = vld [vmem:[%s1476_s3 + $0x8] sm:$0xff] (!%p240_p9)   ;;  %v1111_v7 = vld [vmem:[%s1476_s3 + $0x10] ss:$0 sps:$4 sm:$0xff] (!%p240_p9)   ;;  %vm381_vm2 = vcmask (!%p240_p9), 1043456  }
   0xf   : > { %999 = vmatpush3.bf16.msra.mxu0 (!%p240_p9), %v1107_v0  ;;  %1002 = vmatprep.mubr.msk.bf16.mxu0 (!%p240_p9), %vm1204_vm0, %v1203_v1  ;;  %v383_v8 = vsel (!%p240_p9), %vm381_vm2, %v1111_v7, 0  ;;  %v909_v9 = vld [vmem:[%s1475_s2] ss:$0 sm:$0xff] (!%p240_p9)  ;;  %vm377_vm3 = vcmask (!%p240_p9), 326656   ;;  %v1112_v21 = vld [vmem:[%s1476_s3 + $0x14] sm:$0xff] (!%p240_p9)   ;;  %v1115_v37 = vld [vmem:[%s1476_s3 + $0x28] sm:$0xff] (!%p240_p9)  }
  0x10   : > { %1000 = vmatprep.subr.bf16.mxu0 (!%p240_p9), %v1203_v1  ;;  %1012 = vmatprep.mubr.msk.bf16.mxu1 (!%p240_p9), %vm1204_vm0, %v1203_v1  ;;  %v1113_v22 = vld [vmem:[%s1476_s3 + $0x1c] sm:$0xff] (!%p240_p9)   ;;  %v1114_v23 = vld [vmem:[%s1476_s3 + $0x24] ss:$0 sps:$4 sm:$0xff] (!%p240_p9)   ;;  %v1116_v38 = vld [vmem:[%s1476_s3 + $0x30] sm:$0xff] (!%p240_p9)   ;;  %s267_s14 = sand.u32 (!%p240_p9), 1, %s1193_s25   ;;  %vm828_vm4 = vcmask (!%p240_p9), 392192  }
  0x11   : > { %1007 = vmatpush3.bf16.msra.mxu1 (!%p240_p9), %v1109_v5  ;;  %v464_v24 = vsel (!%p240_p9), %vm381_vm2, %v1114_v23, 0  ;;  %v913_v25 = vld [vmem:[%s1477_s4] ss:$0 sm:$0xff] (!%p240_p9)  ;;  %v1117_v39 = vld [vmem:[%s1476_s3 + $0x38] ss:$0 sps:$4 sm:$0xff] (!%p240_p9)   ;;  %v1119_v54 = vld [vmem:[%s1476_s3 + $0x44] sm:$0xff] (!%p240_p9)  }
  0x12   : > { %1008 = vmatprep.subr.bf16.mxu1 (!%p240_p9), %v1203_v1  ;;  %v545_v40 = vsel (!%p240_p9), %vm381_vm2, %v1117_v39, 0  ;;  %v924_v41 = vld [vmem:[%s1477_s4 + $0x1] ss:$0 sm:$0xff] (!%p240_p9)  ;;  %v1120_v55 = vld [vmem:[%s1476_s3 + $0x4c] ss:$0 sps:$4 sm:$0xff] (!%p240_p9)   ;;  %v1122_v7 = vld [vmem:[%s1476_s3 + $0x58] sm:$0xff] (!%p240_p9)  }
  0x13   : > { %1001 = vmatpush3.bf16.msra.mxu0 (!%p240_p9), %v1108_v2  ;;  %v1118_v53 = vld [vmem:[%s1476_s3 + $0x3c] sm:$0xff] (!%p240_p9)   ;;  %v626_v56 = vsel (!%p240_p9), %vm381_vm2, %v1120_v55, 0  ;;  %v1125_v23 = vld [vmem:[%s1478_s5 + $0x8] sm:$0xff] (!%p240_p9)   ;;  %s907_s15 = sshll.u32 (!%p240_p9), %s267_s14, 3  ;;  %s1205_s8 = smov (!%p240_p9), [#allocation2]  }
  0x14   : > { %1016 = vmatprep.subr.bf16.mxu0 (!%p240_p9), %v1203_v1  ;;  %v935_v57 = vld [vmem:[%s1477_s4 + $0x2] ss:$0 sm:$0xff] (!%p240_p9)  ;;  %s269_s19 = scalar_lea.vmem (!%p240_p9), [#allocation2], %s907_s15  ;;  %s1143_s9 = sshll.u32 (!%p240_p9), %s1205_s8, 4  ;;  %s1144_s9 = int_to_ptr.vmem [resolvable:$false] %s1143_s9 }
  0x15   : > { %s271_s17 = scalar_select %p270_p10, %s1267_s28, 1  ;;  %1009 = vmatpush3.bf16.msra.mxu1 %v1110_v6  ;;  %v1121_v6 = vld [vmem:[%s1476_s3 + $0x50] sm:$0xff]  }
  0x16   : > { %1010 = vmatprep.subr.bf16.mxu1 %v1203_v1  ;;  %s844_s20 = sshll.u32 %s269_s19, 4  ;;  %s1145_s13 = scalar_lea.vmem %s1144_s9, 256  ;;  %s1433_s20 = int_to_ptr.vmem [resolvable:$true] %s844_s20 }
  0x17   : > { %s908_s18 = sshll.u32 %s271_s17, 3  ;;  %s1139_s29 = scalar_lea.vmem %s1433_s20, 128 }
  0x18   : > { %s273_s21 = scalar_lea.vmem %s1473_s0, %s908_s18  ;;  %s968_s18 = sshll.u32 %s1267_s28, 7 }
  0x19   : > { %v275_v3 = vld [vmem:[%s273_s21] sm:$0xff]  ;;  %1011 = vmatpush3.bf16.msra.mxu1 %v383_v8  ;;  %s1431_s23 = scalar_lea.hbm %s1480_s7, %s968_s18  ;;  %s831_s28 = scalar_lea.sflag [#allocation3], %s267_s14 }
  0x1a   : > { %v276_v4 = vpack.c.bf16 %v275_v3, %v275_v3  ;;  %1026 = vmatprep.subr.bf16.mxu1 %v1203_v1  ;;  %v1123_v8 = vld [vmem:[%s1476_s3 + $0x60] ss:$0 sps:$4 sm:$0xff]   ;;  %p1140_p11 = scmp.ne.s32.totalorder %s1433_s20, %s1139_s29  ;;  %p1146_p0 = scmp.lt.s32.totalorder %s1433_s20, %s1144_s9 }
  0x1b   : > { %p1147_p1 = scmp.lt.s32.totalorder %s1145_s13, %s1139_s29 }
  0x1c   : > { %1003 = vmatmul.mubr.msk.bf16.vlgmr.msra.gmra.mrb[0].mxu0 %vm300_vm1, %v276_v4  ;;  %p1141_p12 = pnand %p1140_p11, %p1284_p5 }
  0x1d   : > { %1022 = vmatprep.mubr.msk.bf16.mxu0 %vm1204_vm0, %v1203_v1  ;;  %1017 = vmatpush3.bf16.msra.mxu0 %v1112_v21  ;;  %p1148_p2 = por %p1147_p1, %p1146_p0 }
  0x1e   : > { %1018 = vmatprep.subr.bf16.mxu0 %v1203_v1  ;;  %p1142_p13 = pneg %p1141_p12 }
  0x20   : > { %p1149_p3 = pnand %p1148_p2, %p1142_p13 }
  0x21   : > { %1019 = vmatpush3.bf16.msra.mxu0 %v1113_v22  ;;  %v1124_v22 = vld [vmem:[%s1478_s5] sm:$0xff]  }
  0x22   : > { %1020 = vmatprep.subr.bf16.mxu0 %v1203_v1 }
  0x25   : > { %1021 = vmatpush3.bf16.msra.mxu0 %v464_v24  ;;  %v1126_v24 = vld [vmem:[%s1478_s5 + $0x10] ss:$0 sps:$4 sm:$0xff]  }
  0x26   : > { %1036 = vmatprep.subr.bf16.mxu0 %v1203_v1 }
  0xef   : > { %v338_v10 = vpop.f32.mrb[0].mxu0 }
  0xf0   : > { %v339_v11 = vadd.f32 %v909_v9, %v338_v10  ;;  %v1004_v12 = vpop.f32.mrb[1].mxu0  ;;  %v707_v9 = vsel %vm381_vm2, %v1123_v8, 0  ;;  %v946_v10 = vld [vmem:[%s1477_s4 + $0x3] ss:$0 sm:$0xff] }
  0xf1   : > { %v341_v13 = vpop.f32.mrb[2].mxu0 }
  0xf2   : > { %v345_v14 = vmul.f32 0.70710677, %v339_v11  ;;  %v1005_v15 = vpop.f32.mrb[3].mxu0  ;;  %v344_v17 = vmul.f32 0.5, %v339_v11 }
  0xf4   : > { %1127 = verf.f32 %v345_v14 }
  0xfe   : > { %v1128_v16 = vpop.eup %1127 }
  0xff   : > { %v347_v18 = vadd.f32 1.0, %v1128_v16 }
 0x101   : > { %v348_v19 = vmul.f32 %v347_v18, %v344_v17 }
 0x103   : > { %v349_v20 = vpack.c.bf16 %v348_v19, %v348_v19 }
 0x105   : > { %1013 = vmatmul.mubr.msk.bf16.vlgmr.msra.gmra.mrb[0].mxu1 %vm377_vm3, %v349_v20 }
 0x106   : > { %1032 = vmatprep.mubr.msk.bf16.mxu1 %vm1204_vm0, %v1203_v1  ;;  %1027 = vmatpush3.bf16.msra.mxu1 %v1115_v37  ;;  %v962_v37 = vld [vmem:[%s1479_s6] ss:$0 sm:$0xff] }
 0x107   : > { %1028 = vmatprep.subr.bf16.mxu1 %v1203_v1 }
 0x10a   : > { %1029 = vmatpush3.bf16.msra.mxu1 %v1116_v38 }
 0x10b   : > { %1030 = vmatprep.subr.bf16.mxu1 %v1203_v1 }
 0x10e   : > { %1031 = vmatpush3.bf16.msra.mxu1 %v545_v40 }
 0x10f   : > { %1046 = vmatprep.subr.bf16.mxu1 %v1203_v1 }
 0x1d8   : > { %v419_v26 = vpop.f32.mrb[0].mxu1 }
 0x1d9   : > { %v420_v27 = vadd.f32 %v913_v25, %v419_v26  ;;  %v1014_v28 = vpop.f32.mrb[1].mxu1  ;;  %v786_v25 = vsel %vm381_vm2, %v1126_v24, 0  ;;  %v957_v26 = vld [vmem:[%s1477_s4 + $0x4] ss:$0 sm:$0xff] }
 0x1da   : > { %v422_v29 = vpop.f32.mrb[2].mxu1 }
 0x1db   : > { %v426_v30 = vmul.f32 0.70710677, %v420_v27  ;;  %v1015_v31 = vpop.f32.mrb[3].mxu1  ;;  %v425_v33 = vmul.f32 0.5, %v420_v27 }
 0x1dd   : > { %1129 = verf.f32 %v426_v30 }
 0x1e7   : > { %v1130_v32 = vpop.eup %1129 }
 0x1e8   : > { %v428_v34 = vadd.f32 1.0, %v1130_v32 }
 0x1ea   : > { %v429_v35 = vmul.f32 %v428_v34, %v425_v33 }
 0x1ec   : > { %v430_v36 = vpack.c.bf16 %v429_v35, %v429_v35 }
 0x1ee   : > { %1023 = vmatmul.mubr.msk.bf16.vlgmr.msra.gmra.mrb[4].mxu0 %vm377_vm3, %v430_v36 }
 0x1ef   : > { %1042 = vmatprep.mubr.msk.bf16.mxu0 %vm1204_vm0, %v1203_v1  ;;  %1037 = vmatpush3.bf16.msra.mxu0 %v1118_v53 }
 0x1f0   : > { %1038 = vmatprep.subr.bf16.mxu0 %v1203_v1 }
 0x1f3   : > { %1039 = vmatpush3.bf16.msra.mxu0 %v1119_v54 }
 0x1f4   : > { %1040 = vmatprep.subr.bf16.mxu0 %v1203_v1 }
 0x1f7   : > { %1041 = vmatpush3.bf16.msra.mxu0 %v626_v56 }
 0x1f8   : > { %1056 = vmatprep.subr.bf16.mxu0 %v1203_v1 }
 0x2c1   : > { %v500_v42 = vpop.f32.mrb[4].mxu0 }
 0x2c2   : > { %v501_v43 = vadd.f32 %v924_v41, %v500_v42  ;;  %v1024_v44 = vpop.f32.mrb[5].mxu0 }
 0x2c3   : > { %v503_v45 = vpop.f32.mrb[6].mxu0 }
 0x2c4   : > { %v507_v46 = vmul.f32 0.70710677, %v501_v43  ;;  %v1025_v47 = vpop.f32.mrb[7].mxu0  ;;  %v506_v49 = vmul.f32 0.5, %v501_v43 }
 0x2c6   : > { %1131 = verf.f32 %v507_v46 }
 0x2d0   : > { %v1132_v48 = vpop.eup %1131 }
 0x2d1   : > { %v509_v50 = vadd.f32 1.0, %v1132_v48 }
 0x2d3   : > { %v510_v51 = vmul.f32 %v509_v50, %v506_v49 }
 0x2d5   : > { %v511_v52 = vpack.c.bf16 %v510_v51, %v510_v51 }
 0x2d7   : > { %1033 = vmatmul.mubr.msk.bf16.vlgmr.msra.gmra.mrb[4].mxu1 %vm377_vm3, %v511_v52 }
 0x2d8   : > { %1052 = vmatprep.mubr.msk.bf16.mxu1 %vm1204_vm0, %v1203_v1  ;;  %1047 = vmatpush3.bf16.msra.mxu1 %v1121_v6 }
 0x2d9   : > { %1048 = vmatprep.subr.bf16.mxu1 %v1203_v1 }
 0x2dc   : > { %1049 = vmatpush3.bf16.msra.mxu1 %v1122_v7 }
 0x2dd   : > { %1050 = vmatprep.subr.bf16.mxu1 %v1203_v1 }
 0x2e0   : > { %1051 = vmatpush3.bf16.msra.mxu1 %v707_v9 }
 0x3aa   : > { %v581_v58 = vpop.f32.mrb[4].mxu1 }
 0x3ab   : > { %v582_v59 = vadd.f32 %v935_v57, %v581_v58  ;;  %v1034_v60 = vpop.f32.mrb[5].mxu1 }
 0x3ac   : > { %v584_v61 = vpop.f32.mrb[6].mxu1 }
 0x3ad   : > { %v588_v62 = vmul.f32 0.70710677, %v582_v59  ;;  %v1035_v63 = vpop.f32.mrb[7].mxu1  ;;  %v587_v2 = vmul.f32 0.5, %v582_v59 }
 0x3af   : > { %1133 = verf.f32 %v588_v62 }
 0x3b9   : > { %v1134_v0 = vpop.eup %1133 }
 0x3ba   : > { %v590_v3 = vadd.f32 1.0, %v1134_v0 }
 0x3bc   : > { %v591_v4 = vmul.f32 %v590_v3, %v587_v2 }
 0x3be   : > { %v592_v5 = vpack.c.bf16 %v591_v4, %v591_v4 }
 0x3c0   : > { %1043 = vmatmul.mubr.msk.bf16.vlgmr.msra.gmra.mrb[8].mxu0 %vm377_vm3, %v592_v5 }
 0x3c1   : > { %1062 = vmatprep.mubr.msk.bf16.mxu0 %vm1204_vm0, %v1203_v1  ;;  %1057 = vmatpush3.bf16.msra.mxu0 %v1124_v22 }
 0x3c2   : > { %1058 = vmatprep.subr.bf16.mxu0 %v1203_v1 }
 0x3c5   : > { %1059 = vmatpush3.bf16.msra.mxu0 %v1125_v23 }
 0x3c6   : > { %1060 = vmatprep.subr.bf16.mxu0 %v1203_v1 }
 0x3c9   : > { %1061 = vmatpush3.bf16.msra.mxu0 %v786_v25 }
 0x493   : > { %v662_v11 = vpop.f32.mrb[8].mxu0 }
 0x494   : > { %v663_v12 = vadd.f32 %v946_v10, %v662_v11  ;;  %v1044_v13 = vpop.f32.mrb[9].mxu0 }
 0x495   : > { %v665_v14 = vpop.f32.mrb[10].mxu0 }
 0x496   : > { %v669_v15 = vmul.f32 0.70710677, %v663_v12  ;;  %v1045_v16 = vpop.f32.mrb[11].mxu0  ;;  %v668_v18 = vmul.f32 0.5, %v663_v12 }
 0x498   : > { %1135 = verf.f32 %v669_v15 }
 0x4a2   : > { %v1136_v17 = vpop.eup %1135 }
 0x4a3   : > { %v671_v19 = vadd.f32 1.0, %v1136_v17 }
 0x4a5   : > { %v672_v20 = vmul.f32 %v671_v19, %v668_v18 }
 0x4a7   : > { %v673_v21 = vpack.c.bf16 %v672_v20, %v672_v20 }
 0x4a9   : > { %1053 = vmatmul.mubr.msk.bf16.vlgmr.msra.gmra.mrb[8].mxu1 %vm377_vm3, %v673_v21 }
 0x57c   : > { %v743_v27 = vpop.f32.mrb[8].mxu1 }
 0x57d   : > { %v744_v28 = vadd.f32 %v957_v26, %v743_v27  ;;  %v1054_v29 = vpop.f32.mrb[9].mxu1 }
 0x57e   : > { %v746_v30 = vpop.f32.mrb[10].mxu1 }
 0x57f   : > { %v750_v31 = vmul.f32 0.70710677, %v744_v28  ;;  %v1055_v32 = vpop.f32.mrb[11].mxu1  ;;  %v749_v33 = vmul.f32 0.5, %v744_v28 }
 0x581   : > { %1137 = verf.f32 %v750_v31 }
 0x58b   : > { %v1138_v1 = vpop.eup %1137 }
 0x58c   : > { %v752_v34 = vadd.f32 1.0, %v1138_v1 }
 0x58e   : > { %v753_v35 = vmul.f32 %v752_v34, %v749_v33 }
 0x590   : > { %v754_v36 = vpack.c.bf16 %v753_v35, %v753_v35 }
 0x592   : > { %1063 = vmatmul.mubr.msk.bf16.vlgmr.msra.gmra.mrb[12].mxu0 %vm377_vm3, %v754_v36 }
 0x665   : > { %v822_v38 = vpop.f32.mrb[12].mxu0 }
 0x666   : > { %v823_v39 = vadd.f32 %v962_v37, %v822_v38  ;;  %v1064_v40 = vpop.f32.mrb[13].mxu0 }
 0x667   : > { %v825_v41 = vpop.f32.mrb[14].mxu0 }
 0x668   : > { %v1065_v42 = vpop.f32.mrb[15].mxu0  ;;  %829 = vst.msk [vmem:[%s269_s19] sm:$0xff] %vm828_vm4, %v823_v39 }
 0x669   : > { %1152 = shalt.err (!%p1149_p3)
}
 0x66a   : > { %s1153_s14 = scalar_lea.hbm %s1431_s23, 128  ;;  %s1157_s17 = scalar_lea.hbm %s1480_s7, 256 }
 0x66b   : > { %p1154_p4 = scmp.ne.s32.totalorder %s1431_s23, %s1153_s14  ;;  %p1158_p9 = scmp.lt.u32.totalorder %s1431_s23, %s1480_s7 }
 0x66c   : > { %p1159_p10 = scmp.lt.u32.totalorder %s1157_s17, %s1153_s14  ;;  %p1161_p12 = scmp.lt.u32.totalorder %s1153_s14, %s1431_s23 }
 0x66d   : > { %p1155_p7 = pnand %p1154_p4, %p1284_p5 }
 0x66e   : > { %p1160_p11 = por %p1159_p10, %p1158_p9 }
 0x66f   : > { %p1156_p8 = pneg %p1155_p7 }
 0x670   : > { %p1162_p13 = por %p1161_p12, %p1160_p11 }
 0x672   : > { %p1163_p0 = pnand %p1162_p13, %p1156_p8 }
 0x674   : > { %1166 = shalt.err (!%p1163_p0)
}
 0x675   : > { %1066 = dma.vmem_to_hbm [thread:$0]  (%p1284_p5), %s1433_s20, 128, %s1431_s23, %s831_s28  }
 0x676 PF: > { %p1072_p1 = scmp.ge.s32.totalorder %s1201_s27, 2  ;;  %s856_s21 = sand.u32 1, %s1189_s24  }
 0x677   : > { %s857_s22 = scalar_lea.sflag [#allocation3], %s856_s21 }
 0x678   : > { %p1069_p2 = pnand %p1072_p1, %p1288_p6 }
 0x67a   : > { %1184 = dma.done.wait (!%p1069_p2), %s857_s22, 128  }
 0x67b   : > { %1186 = vsyncadd (!%p1069_p2), %s857_s22, 4294967168  ;;  %p17_p3 = scmp.ge.s32.totalorder %s1271_s30, 4   ;;  %s1483_s24 = smov %s1193_s25 }
 0x67c   : > { %s1484_s25 = smov %s1197_s26  ;;  %s1485_s26 = smov %s1282_s10 }
 0x67d   : > { %s1486_s27 = smov %s1271_s30  ;;  %19 = sbr.rel (!%p17_p3) target bundleno = 3 (0x3), region = 91 }
 0x684   :  { %862 = vsyncpa [#allocation3], 1 }
 0x685   :  { %864 = vsyncpa [#allocation3 + $0x1], 1 }

</bundles_post_ra>
